<compile_context>
chip_gen: v5e
topology: v5e:2x2
jax: 0.10.0
libtpu: 0.0.40
codegen_flags: <defaults>
</compile_context>

<pallas_src>
import functools

import jax
import jax.numpy as jnp
from jax import lax
from jax.experimental import pallas as pl
from jax.experimental.pallas import tpu as pltpu


# ----------------------------------------------------------------------------
# Kernel: one (batch, q-tile, head) grid step.
# ----------------------------------------------------------------------------
def _sdpa_kernel(
    q_in_ref, k_in_ref, v_in_ref,
    wq_ref, bq_ref, wk_ref, bk_ref, wv_ref, bv_ref,
    wo_ref, bo_ref, relk_ref, relv_ref,
    o_ref, acc_ref,
    *, max_rel, inv_scale,
):
    f32 = jnp.float32
    qi = pl.program_id(1)
    hh = pl.program_id(2)
    tq = q_in_ref.shape[0]
    nk = k_in_ref.shape[0]

    # Per-head projections; head was selected by the BlockSpec index_map on a
    # leading weight axis, so there is no lane slicing here.
    q = jnp.dot(q_in_ref[...], wq_ref[...], preferred_element_type=f32) + bq_ref[...]
    k = jnp.dot(k_in_ref[...], wk_ref[...], preferred_element_type=f32) + bk_ref[...]
    v = jnp.dot(v_in_ref[...], wv_ref[...], preferred_element_type=f32) + bv_ref[...]

    dn = (((1,), (1,)), ((), ()))  # contract last dim vs last dim (no explicit .T)

    # content score + relative-key table score
    attn1 = lax.dot_general(q, k, dn, preferred_element_type=f32)            # (tq, nk)
    a_tab = lax.dot_general(q, relk_ref[...], dn, preferred_element_type=f32)  # (tq, R+1)

    # clipped |j - i| distance for this q-row tile (single int32 tile, no f32 masks)
    q0 = qi * tq
    i_idx = lax.broadcasted_iota(jnp.int32, (tq, nk), 0) + q0
    j_idx = lax.broadcasted_iota(jnp.int32, (tq, nk), 1)
    dist = jnp.minimum(jnp.abs(j_idx - i_idx), max_rel)

    # attn2: scatter the per-bucket table scores by distance (select chain)
    attn2 = jnp.zeros((tq, nk), f32)
    for r in range(max_rel + 1):
        attn2 = jnp.where(dist == r, a_tab[:, r:r + 1], attn2)

    s = (attn1 + attn2) * inv_scale
    m = jnp.max(s, axis=-1, keepdims=True)
    p = jnp.exp(s - m)                                   # unnormalized weights
    l = jnp.sum(p, axis=-1, keepdims=True)
    inv_l = pl.reciprocal(l, approx=True)                # EUP vrcp
    inv_l = inv_l * (2.0 - l * inv_l)                    # one Newton step

    # content value term
    w1 = jnp.dot(p, v, preferred_element_type=f32)       # (tq, d_v)

    # bucket-sum matrix (tq, R+1) -> one small MXU dot against the value table
    pb_cols = [
        jnp.sum(jnp.where(dist == r, p, 0.0), axis=-1, keepdims=True)
        for r in range(max_rel + 1)
    ]
    pb = jnp.concatenate(pb_cols, axis=-1)               # (tq, R+1)
    w2 = jnp.dot(pb, relv_ref[...], preferred_element_type=f32)  # (tq, d_v)

    res = (w1 + w2) * inv_l                              # (tq, d_v)

    # P3: accumulate the fused output projection across heads in VMEM scratch
    @pl.when(hh == 0)
    def _():
        acc_ref[...] = jnp.broadcast_to(bo_ref[...], acc_ref.shape)

    acc_ref[...] += jnp.dot(res, wo_ref[...], preferred_element_type=f32)

    @pl.when(hh == pl.num_programs(2) - 1)
    def _():
        o_ref[...] = acc_ref[...].astype(o_ref.dtype)


# ----------------------------------------------------------------------------
# Wrapper
# ----------------------------------------------------------------------------
def self_scaled_dot_product_attention(params, queries, keys, values):
    """queries/keys/values: (b, n, d_model) float32 -> (b, nq, d_model)."""
    b, nq, d_model = queries.shape
    nk = keys.shape[1]
    h, d_k, d_v = params["h"], params["d_k"], params["d_v"]
    max_rel = params["max_rel"]
    R = max_rel + 1

    # q-row tile: full rows for short sequences, 256-row tiles when they divide.
    if nq <= 256 or nq % 256 != 0:
        tq = nq
    else:
        tq = 256
    n_qt = nq // tq

    kern = functools.partial(
        _sdpa_kernel, max_rel=max_rel, inv_scale=1.0 / float(d_v) ** 0.5)

    grid = (b, n_qt, h)

    in_specs = [
        pl.BlockSpec((None, tq, d_model), lambda bb, qi, hh: (bb, qi, 0)),   # queries
        pl.BlockSpec((None, nk, d_model), lambda bb, qi, hh: (bb, 0, 0)),    # keys
        pl.BlockSpec((None, nk, d_model), lambda bb, qi, hh: (bb, 0, 0)),    # values
        pl.BlockSpec((None, d_model, d_k), lambda bb, qi, hh: (hh, 0, 0)),   # Wq^T  (per head)
        pl.BlockSpec((None, 1, d_k), lambda bb, qi, hh: (hh, 0, 0)),         # bq
        pl.BlockSpec((None, d_model, d_k), lambda bb, qi, hh: (hh, 0, 0)),   # Wk^T
        pl.BlockSpec((None, 1, d_k), lambda bb, qi, hh: (hh, 0, 0)),         # bk
        pl.BlockSpec((None, d_model, d_v), lambda bb, qi, hh: (hh, 0, 0)),   # Wv^T
        pl.BlockSpec((None, 1, d_v), lambda bb, qi, hh: (hh, 0, 0)),         # bv
        pl.BlockSpec((None, d_v, d_model), lambda bb, qi, hh: (hh, 0, 0)),   # Wo^T  (per head)
        pl.BlockSpec((1, d_model), lambda bb, qi, hh: (0, 0)),               # bo
        pl.BlockSpec((R, d_k), lambda bb, qi, hh: (0, 0)),                   # rel_k table
        pl.BlockSpec((R, d_v), lambda bb, qi, hh: (0, 0)),                   # rel_v table
    ]
    out_spec = pl.BlockSpec((None, tq, d_model), lambda bb, qi, hh: (bb, qi, 0))

    flops = 2 * b * h * (
        nq * d_model * d_k + nk * d_model * d_k + nk * d_model * d_v
        + nq * nk * d_k + nq * R * d_k
        + nq * nk * d_v + nq * R * d_v
        + nq * d_v * d_model)
    transcendentals = b * h * nq * nk
    bytes_accessed = 4 * (
        queries.size + keys.size + values.size + b * nq * d_model
        + params["WqT_h"].size + params["WkT_h"].size + params["WvT_h"].size
        + params["WoT_h"].size + params["rel_k_table"].size
        + params["rel_v_table"].size + 2 * h * d_k + h * d_v + d_model)

    out = pl.pallas_call(
        kern,
        out_shape=jax.ShapeDtypeStruct((b, nq, d_model), jnp.float32),
        grid_spec=pltpu.PrefetchScalarGridSpec(
            num_scalar_prefetch=0,
            grid=grid,
            in_specs=in_specs,
            out_specs=out_spec,
            scratch_shapes=[pltpu.VMEM((tq, d_model), jnp.float32)]),
        compiler_params=pltpu.CompilerParams(
            dimension_semantics=("parallel", "parallel", "arbitrary"),
            vmem_limit_bytes=64 * 1024 * 1024),
        cost_estimate=pl.CostEstimate(
            flops=int(flops),
            transcendentals=int(transcendentals),
            bytes_accessed=int(bytes_accessed)),
    )(
        queries, keys, values,
        params["WqT_h"], params["bq_h"],
        params["WkT_h"], params["bk_h"],
        params["WvT_h"], params["bv_h"],
        params["WoT_h"], params["bo"],
        params["rel_k_table"], params["rel_v_table"],
    )
    return out


# ----------------------------------------------------------------------------
# Parameter init (mirrors nn.init.xavier_uniform_ / zero bias).  Weights are
# stored pre-transposed and pre-split per head ONCE so the forward never
# re-derives W.T or lane-slices a head inside the kernel.
# ----------------------------------------------------------------------------
def xavier_uniform(key, shape):
    # PyTorch xavier_uniform_ for Linear weight (out, in): bound = sqrt(6/(in+out))
    fan_out, fan_in = shape[0], shape[1]
    bound = (6.0 / (fan_in + fan_out)) ** 0.5
    return jax.random.uniform(key, shape, jnp.float32, -bound, bound)


def make_params(key, d_model, d_k, d_v, h, max_rel):
    ks = jax.random.split(key, 6)
    wq = xavier_uniform(ks[0], (h * d_k, d_model))   # PyTorch Linear layout (out, in)
    wk = xavier_uniform(ks[1], (h * d_k, d_model))
    wv = xavier_uniform(ks[2], (h * d_v, d_model))
    wo = xavier_uniform(ks[3], (d_model, h * d_v))
    wqt, wkt, wvt, wot = wq.T, wk.T, wv.T, wo.T       # (in, out) layouts
    return {
        "h": h, "d_k": d_k, "d_v": d_v, "max_rel": max_rel,
        # flat layouts (reference path)
        "WqT": wqt, "WkT": wkt, "WvT": wvt, "WoT": wot,
        "bq": jnp.zeros((1, h * d_k), jnp.float32),
        "bk": jnp.zeros((1, h * d_k), jnp.float32),
        "bv": jnp.zeros((1, h * d_v), jnp.float32),
        "bo": jnp.zeros((1, d_model), jnp.float32),
        # per-head layouts (kernel path): head on the LEADING axis so head
        # selection is a BlockSpec block index, never a lane slice.
        "WqT_h": wqt.reshape(d_model, h, d_k).transpose(1, 0, 2),
        "WkT_h": wkt.reshape(d_model, h, d_k).transpose(1, 0, 2),
        "WvT_h": wvt.reshape(d_model, h, d_v).transpose(1, 0, 2),
        "WoT_h": wot.reshape(h, d_v, d_model),
        "bq_h": jnp.zeros((h, 1, d_k), jnp.float32),
        "bk_h": jnp.zeros((h, 1, d_k), jnp.float32),
        "bv_h": jnp.zeros((h, 1, d_v), jnp.float32),
        "rel_k_table": xavier_uniform(ks[4], (max_rel + 1, d_k)),
        "rel_v_table": xavier_uniform(ks[5], (max_rel + 1, d_v)),
    }


# ----------------------------------------------------------------------------
# Pure-JAX reference (straightforward gather formulation) for correctness.
# ----------------------------------------------------------------------------
def relative_position_embeddings(table, length_q, length_k):
    max_rel = table.shape[0] - 1
    rq = jnp.arange(length_q)
    rk = jnp.arange(length_k)
    dist = jnp.abs(rk[None, :] - rq[:, None])
    idx = jnp.clip(dist, 0, max_rel)
    return jnp.take(table, idx, axis=0)  # (len_q, len_k, num_units)


def reference_forward(params, queries, keys, values):
    b, nq, d_model = queries.shape
    nk = keys.shape[1]
    h, d_k, d_v = params["h"], params["d_k"], params["d_v"]

    q = queries @ params["WqT"] + params["bq"]
    k = keys @ params["WkT"] + params["bk"]
    v = values @ params["WvT"] + params["bv"]

    rq1 = q.reshape(b, nq, h, d_k).transpose(0, 2, 1, 3)
    rk1 = k.reshape(b, nk, h, d_k).transpose(0, 2, 1, 3)
    rv1 = v.reshape(b, nk, h, d_v).transpose(0, 2, 1, 3)

    attn1 = jnp.einsum("bhid,bhjd->bhij", rq1, rk1)
    rk2 = relative_position_embeddings(params["rel_k_table"], nq, nk)
    attn2 = jnp.einsum("bhid,ijd->bhij", rq1, rk2)
    attn = (attn1 + attn2) / jnp.sqrt(jnp.float32(d_v))
    attn = jax.nn.softmax(attn, axis=-1)

    w1 = jnp.einsum("bhij,bhjd->bhid", attn, rv1)
    rv2 = relative_position_embeddings(params["rel_v_table"], nq, nk)
    w2 = jnp.einsum("bhij,ijd->bhid", attn, rv2)
    x = (w1 + w2).transpose(0, 2, 1, 3).reshape(b, nq, h * d_v)
    return x @ params["WoT"] + params["bo"]


# ----------------------------------------------------------------------------
if __name__ == "__main__":
    batch, seq, d_model, h, d_k, d_v = 2, 8, 32, 4, 8, 8
    max_rel = 4

    key = jax.random.PRNGKey(0)
    kp, kq, kk, kv = jax.random.split(key, 4)

    params = make_params(kp, d_model, d_k, d_v, h, max_rel)

    queries = jax.random.normal(kq, (batch, seq, d_model), jnp.float32)
    keys_in = jax.random.normal(kk, (batch, seq, d_model), jnp.float32)
    values = jax.random.normal(kv, (batch, seq, d_model), jnp.float32)

    out = self_scaled_dot_product_attention(params, queries, keys_in, values)
    out = jax.block_until_ready(out)

    ref = reference_forward(params, queries, keys_in, values)
    assert out.shape == (batch, seq, d_model)
    assert jnp.allclose(out, ref, atol=1e-3, rtol=1e-3), "mismatch vs reference"

    print("KERNEL_OK")
</pallas_src>

<mosaic_0001>
module attributes {stable_mosaic.version = 11 : i64} {
  func.func @_sdpa_kernel(%arg0: i32, %arg1: i32, %arg2: i32, %arg3: memref<1x8x32xf32, #tpu.memory_space<vmem>>, %arg4: memref<1x8x32xf32, #tpu.memory_space<vmem>>, %arg5: memref<1x8x32xf32, #tpu.memory_space<vmem>>, %arg6: memref<1x32x8xf32, #tpu.memory_space<vmem>>, %arg7: memref<1x1x8xf32, #tpu.memory_space<vmem>>, %arg8: memref<1x32x8xf32, #tpu.memory_space<vmem>>, %arg9: memref<1x1x8xf32, #tpu.memory_space<vmem>>, %arg10: memref<1x32x8xf32, #tpu.memory_space<vmem>>, %arg11: memref<1x1x8xf32, #tpu.memory_space<vmem>>, %arg12: memref<1x8x32xf32, #tpu.memory_space<vmem>>, %arg13: memref<1x32xf32, #tpu.memory_space<vmem>>, %arg14: memref<5x8xf32, #tpu.memory_space<vmem>>, %arg15: memref<5x8xf32, #tpu.memory_space<vmem>>, %arg16: memref<1x8x32xf32, #tpu.memory_space<vmem>>, %arg17: memref<8x32xf32, #tpu.memory_space<vmem>>) attributes {dimension_semantics = [#tpu.dimension_semantics<parallel>, #tpu.dimension_semantics<parallel>, #tpu.dimension_semantics<arbitrary>], iteration_bounds = array<i64: 2, 1, 4>, scalar_prefetch = 0 : i64, scratch_operands = 1 : i64, tpu.core_type = #tpu.core_type<tc>, window_params = [{transform_indices = @transform_0, window_bounds = array<i64: 1, 8, 32>}, {transform_indices = @transform_1, window_bounds = array<i64: 1, 8, 32>}, {transform_indices = @transform_2, window_bounds = array<i64: 1, 8, 32>}, {transform_indices = @transform_3, window_bounds = array<i64: 1, 32, 8>}, {transform_indices = @transform_4, window_bounds = array<i64: 1, 1, 8>}, {transform_indices = @transform_5, window_bounds = array<i64: 1, 32, 8>}, {transform_indices = @transform_6, window_bounds = array<i64: 1, 1, 8>}, {transform_indices = @transform_7, window_bounds = array<i64: 1, 32, 8>}, {transform_indices = @transform_8, window_bounds = array<i64: 1, 1, 8>}, {transform_indices = @transform_9, window_bounds = array<i64: 1, 8, 32>}, {pipeline_mode = #tpu.pipeline_mode<synchronous>, transform_indices = @transform_10, window_bounds = array<i64: 1, 32>}, {pipeline_mode = #tpu.pipeline_mode<synchronous>, transform_indices = @transform_11, window_bounds = array<i64: 5, 8>}, {pipeline_mode = #tpu.pipeline_mode<synchronous>, transform_indices = @transform_12, window_bounds = array<i64: 5, 8>}, {transform_indices = @transform_13, window_bounds = array<i64: 1, 8, 32>}]} {
    %c0 = arith.constant 0 : index
    %c0_0 = arith.constant 0 : index
    %c0_1 = arith.constant 0 : index
    %0 = vector.load %arg3[%c0, %c0_0, %c0_1] : memref<1x8x32xf32, #tpu.memory_space<vmem>>, vector<1x8x32xf32>
    %1 = vector.shape_cast %0 : vector<1x8x32xf32> to vector<8x32xf32>
    %c0_2 = arith.constant 0 : index
    %c0_3 = arith.constant 0 : index
    %c0_4 = arith.constant 0 : index
    %2 = vector.load %arg6[%c0_2, %c0_3, %c0_4] : memref<1x32x8xf32, #tpu.memory_space<vmem>>, vector<1x32x8xf32>
    %3 = vector.shape_cast %2 : vector<1x32x8xf32> to vector<32x8xf32>
    %cst = arith.constant dense<0.000000e+00> : vector<8x8xf32>
    %4 = tpu.matmul %1, %3, %cst {dimension_numbers = #tpu.dot_dimension_numbers<[1], [0], [0], [1], [0, 0, 1, 1], [], []>} : vector<8x32xf32>, vector<32x8xf32>, vector<8x8xf32> -> vector<8x8xf32>
    %c0_5 = arith.constant 0 : index
    %c0_6 = arith.constant 0 : index
    %c0_7 = arith.constant 0 : index
    %5 = vector.load %arg7[%c0_5, %c0_6, %c0_7] : memref<1x1x8xf32, #tpu.memory_space<vmem>>, vector<1x1x8xf32>
    %6 = vector.shape_cast %5 : vector<1x1x8xf32> to vector<1x8xf32>
    %7 = vector.broadcast %6 : vector<1x8xf32> to vector<8x8xf32>
    %8 = arith.addf %4, %7 : vector<8x8xf32>
    %c0_8 = arith.constant 0 : index
    %c0_9 = arith.constant 0 : index
    %c0_10 = arith.constant 0 : index
    %9 = vector.load %arg4[%c0_8, %c0_9, %c0_10] : memref<1x8x32xf32, #tpu.memory_space<vmem>>, vector<1x8x32xf32>
    %10 = vector.shape_cast %9 : vector<1x8x32xf32> to vector<8x32xf32>
    %c0_11 = arith.constant 0 : index
    %c0_12 = arith.constant 0 : index
    %c0_13 = arith.constant 0 : index
    %11 = vector.load %arg8[%c0_11, %c0_12, %c0_13] : memref<1x32x8xf32, #tpu.memory_space<vmem>>, vector<1x32x8xf32>
    %12 = vector.shape_cast %11 : vector<1x32x8xf32> to vector<32x8xf32>
    %cst_14 = arith.constant dense<0.000000e+00> : vector<8x8xf32>
    %13 = tpu.matmul %10, %12, %cst_14 {dimension_numbers = #tpu.dot_dimension_numbers<[1], [0], [0], [1], [0, 0, 1, 1], [], []>} : vector<8x32xf32>, vector<32x8xf32>, vector<8x8xf32> -> vector<8x8xf32>
    %c0_15 = arith.constant 0 : index
    %c0_16 = arith.constant 0 : index
    %c0_17 = arith.constant 0 : index
    %14 = vector.load %arg9[%c0_15, %c0_16, %c0_17] : memref<1x1x8xf32, #tpu.memory_space<vmem>>, vector<1x1x8xf32>
    %15 = vector.shape_cast %14 : vector<1x1x8xf32> to vector<1x8xf32>
    %16 = vector.broadcast %15 : vector<1x8xf32> to vector<8x8xf32>
    %17 = arith.addf %13, %16 : vector<8x8xf32>
    %c0_18 = arith.constant 0 : index
    %c0_19 = arith.constant 0 : index
    %c0_20 = arith.constant 0 : index
    %18 = vector.load %arg5[%c0_18, %c0_19, %c0_20] : memref<1x8x32xf32, #tpu.memory_space<vmem>>, vector<1x8x32xf32>
    %19 = vector.shape_cast %18 : vector<1x8x32xf32> to vector<8x32xf32>
    %c0_21 = arith.constant 0 : index
    %c0_22 = arith.constant 0 : index
    %c0_23 = arith.constant 0 : index
    %20 = vector.load %arg10[%c0_21, %c0_22, %c0_23] : memref<1x32x8xf32, #tpu.memory_space<vmem>>, vector<1x32x8xf32>
    %21 = vector.shape_cast %20 : vector<1x32x8xf32> to vector<32x8xf32>
    %cst_24 = arith.constant dense<0.000000e+00> : vector<8x8xf32>
    %22 = tpu.matmul %19, %21, %cst_24 {dimension_numbers = #tpu.dot_dimension_numbers<[1], [0], [0], [1], [0, 0, 1, 1], [], []>} : vector<8x32xf32>, vector<32x8xf32>, vector<8x8xf32> -> vector<8x8xf32>
    %c0_25 = arith.constant 0 : index
    %c0_26 = arith.constant 0 : index
    %c0_27 = arith.constant 0 : index
    %23 = vector.load %arg11[%c0_25, %c0_26, %c0_27] : memref<1x1x8xf32, #tpu.memory_space<vmem>>, vector<1x1x8xf32>
    %24 = vector.shape_cast %23 : vector<1x1x8xf32> to vector<1x8xf32>
    %25 = vector.broadcast %24 : vector<1x8xf32> to vector<8x8xf32>
    %26 = arith.addf %22, %25 : vector<8x8xf32>
    %cst_28 = arith.constant dense<0.000000e+00> : vector<8x8xf32>
    %27 = tpu.matmul %8, %17, %cst_28 {dimension_numbers = #tpu.dot_dimension_numbers<[1], [1], [0], [0], [0, 0, 1, 0], [], []>} : vector<8x8xf32>, vector<8x8xf32>, vector<8x8xf32> -> vector<8x8xf32>
    %c0_29 = arith.constant 0 : index
    %c0_30 = arith.constant 0 : index
    %28 = vector.load %arg14[%c0_29, %c0_30] : memref<5x8xf32, #tpu.memory_space<vmem>>, vector<5x8xf32>
    %cst_31 = arith.constant dense<0.000000e+00> : vector<8x5xf32>
    %29 = tpu.matmul %8, %28, %cst_31 {dimension_numbers = #tpu.dot_dimension_numbers<[1], [1], [0], [0], [0, 0, 1, 0], [], []>} : vector<8x8xf32>, vector<5x8xf32>, vector<8x5xf32> -> vector<8x5xf32>
    %c8_i32 = arith.constant 8 : i32
    %30 = arith.muli %arg1, %c8_i32 : i32
    %31 = tpu.iota {dimensions = array<i32: 0>} : vector<8x8xi32>
    %32 = vector.broadcast %30 : i32 to vector<8x8xi32>
    %33 = arith.addi %31, %32 : vector<8x8xi32>
    %34 = tpu.iota {dimensions = array<i32: 1>} : vector<8x8xi32>
    %35 = arith.subi %34, %33 : vector<8x8xi32>
    %36 = math.absi %35 : vector<8x8xi32>
    %c4_i32 = arith.constant 4 : i32
    %37 = vector.broadcast %c4_i32 : i32 to vector<8x8xi32>
    %38 = arith.minsi %36, %37 : vector<8x8xi32>
    %cst_32 = arith.constant 0.000000e+00 : f32
    %39 = vector.broadcast %cst_32 : f32 to vector<8x8xf32>
    %c0_i32 = arith.constant 0 : i32
    %40 = vector.broadcast %c0_i32 : i32 to vector<8x8xi32>
    %41 = arith.cmpi eq, %38, %40 : vector<8x8xi32>
    %42 = vector.extract_strided_slice %29 {offsets = [0, 0], sizes = [8, 1], strides = [1, 1]} : vector<8x5xf32> to vector<8x1xf32>
    %43 = vector.shape_cast %42 : vector<8x1xf32> to vector<8x1xf32>
    %44 = vector.broadcast %43 : vector<8x1xf32> to vector<8x8xf32>
    %45 = arith.select %41, %44, %39 : vector<8x8xi1>, vector<8x8xf32>
    %c1_i32 = arith.constant 1 : i32
    %46 = vector.broadcast %c1_i32 : i32 to vector<8x8xi32>
    %47 = arith.cmpi eq, %38, %46 : vector<8x8xi32>
    %48 = vector.extract_strided_slice %29 {offsets = [0, 1], sizes = [8, 1], strides = [1, 1]} : vector<8x5xf32> to vector<8x1xf32>
    %49 = vector.shape_cast %48 : vector<8x1xf32> to vector<8x1xf32>
    %50 = vector.broadcast %49 : vector<8x1xf32> to vector<8x8xf32>
    %51 = arith.select %47, %50, %45 : vector<8x8xi1>, vector<8x8xf32>
    %c2_i32 = arith.constant 2 : i32
    %52 = vector.broadcast %c2_i32 : i32 to vector<8x8xi32>
    %53 = arith.cmpi eq, %38, %52 : vector<8x8xi32>
    %54 = vector.extract_strided_slice %29 {offsets = [0, 2], sizes = [8, 1], strides = [1, 1]} : vector<8x5xf32> to vector<8x1xf32>
    %55 = vector.shape_cast %54 : vector<8x1xf32> to vector<8x1xf32>
    %56 = vector.broadcast %55 : vector<8x1xf32> to vector<8x8xf32>
    %57 = arith.select %53, %56, %51 : vector<8x8xi1>, vector<8x8xf32>
    %c3_i32 = arith.constant 3 : i32
    %58 = vector.broadcast %c3_i32 : i32 to vector<8x8xi32>
    %59 = arith.cmpi eq, %38, %58 : vector<8x8xi32>
    %60 = vector.extract_strided_slice %29 {offsets = [0, 3], sizes = [8, 1], strides = [1, 1]} : vector<8x5xf32> to vector<8x1xf32>
    %61 = vector.shape_cast %60 : vector<8x1xf32> to vector<8x1xf32>
    %62 = vector.broadcast %61 : vector<8x1xf32> to vector<8x8xf32>
    %63 = arith.select %59, %62, %57 : vector<8x8xi1>, vector<8x8xf32>
    %c4_i32_33 = arith.constant 4 : i32
    %64 = vector.broadcast %c4_i32_33 : i32 to vector<8x8xi32>
    %65 = arith.cmpi eq, %38, %64 : vector<8x8xi32>
    %66 = vector.extract_strided_slice %29 {offsets = [0, 4], sizes = [8, 1], strides = [1, 1]} : vector<8x5xf32> to vector<8x1xf32>
    %67 = vector.shape_cast %66 : vector<8x1xf32> to vector<8x1xf32>
    %68 = vector.broadcast %67 : vector<8x1xf32> to vector<8x8xf32>
    %69 = arith.select %65, %68, %63 : vector<8x8xi1>, vector<8x8xf32>
    %70 = arith.addf %27, %69 : vector<8x8xf32>
    %cst_34 = arith.constant 0.353553385 : f32
    %71 = vector.broadcast %cst_34 : f32 to vector<8x8xf32>
    %72 = arith.mulf %70, %71 : vector<8x8xf32>
    %cst_35 = arith.constant dense<0xFF800000> : vector<8xf32>
    %73 = vector.multi_reduction <maximumf>, %72, %cst_35 [1] : vector<8x8xf32> to vector<8xf32>
    %74 = vector.shape_cast %73 : vector<8xf32> to vector<8x1xf32>
    %75 = vector.broadcast %74 : vector<8x1xf32> to vector<8x8xf32>
    %76 = arith.subf %72, %75 : vector<8x8xf32>
    %77 = math.exp %76 : vector<8x8xf32>
    %cst_36 = arith.constant dense<0.000000e+00> : vector<8xf32>
    %78 = vector.multi_reduction <add>, %77, %cst_36 [1] : vector<8x8xf32> to vector<8xf32>
    %79 = vector.shape_cast %78 : vector<8xf32> to vector<8x1xf32>
    %80 = tpu.reciprocal %79 {approx = true} : vector<8x1xf32> -> vector<8x1xf32>
    %81 = arith.mulf %79, %80 : vector<8x1xf32>
    %cst_37 = arith.constant 2.000000e+00 : f32
    %82 = vector.broadcast %cst_37 : f32 to vector<8x1xf32>
    %83 = arith.subf %82, %81 : vector<8x1xf32>
    %84 = arith.mulf %80, %83 : vector<8x1xf32>
    %cst_38 = arith.constant dense<0.000000e+00> : vector<8x8xf32>
    %85 = tpu.matmul %77, %26, %cst_38 {dimension_numbers = #tpu.dot_dimension_numbers<[1], [0], [0], [1], [0, 0, 1, 1], [], []>} : vector<8x8xf32>, vector<8x8xf32>, vector<8x8xf32> -> vector<8x8xf32>
    %c0_i32_39 = arith.constant 0 : i32
    %86 = vector.broadcast %c0_i32_39 : i32 to vector<8x8xi32>
    %87 = arith.cmpi eq, %38, %86 : vector<8x8xi32>
    %cst_40 = arith.constant 0.000000e+00 : f32
    %88 = vector.broadcast %cst_40 : f32 to vector<8x8xf32>
    %89 = arith.select %87, %77, %88 : vector<8x8xi1>, vector<8x8xf32>
    %cst_41 = arith.constant dense<0.000000e+00> : vector<8xf32>
    %90 = vector.multi_reduction <add>, %89, %cst_41 [1] : vector<8x8xf32> to vector<8xf32>
    %91 = vector.shape_cast %90 : vector<8xf32> to vector<8x1xf32>
    %c1_i32_42 = arith.constant 1 : i32
    %92 = vector.broadcast %c1_i32_42 : i32 to vector<8x8xi32>
    %93 = arith.cmpi eq, %38, %92 : vector<8x8xi32>
    %cst_43 = arith.constant 0.000000e+00 : f32
    %94 = vector.broadcast %cst_43 : f32 to vector<8x8xf32>
    %95 = arith.select %93, %77, %94 : vector<8x8xi1>, vector<8x8xf32>
    %cst_44 = arith.constant dense<0.000000e+00> : vector<8xf32>
    %96 = vector.multi_reduction <add>, %95, %cst_44 [1] : vector<8x8xf32> to vector<8xf32>
    %97 = vector.shape_cast %96 : vector<8xf32> to vector<8x1xf32>
    %c2_i32_45 = arith.constant 2 : i32
    %98 = vector.broadcast %c2_i32_45 : i32 to vector<8x8xi32>
    %99 = arith.cmpi eq, %38, %98 : vector<8x8xi32>
    %cst_46 = arith.constant 0.000000e+00 : f32
    %100 = vector.broadcast %cst_46 : f32 to vector<8x8xf32>
    %101 = arith.select %99, %77, %100 : vector<8x8xi1>, vector<8x8xf32>
    %cst_47 = arith.constant dense<0.000000e+00> : vector<8xf32>
    %102 = vector.multi_reduction <add>, %101, %cst_47 [1] : vector<8x8xf32> to vector<8xf32>
    %103 = vector.shape_cast %102 : vector<8xf32> to vector<8x1xf32>
    %c3_i32_48 = arith.constant 3 : i32
    %104 = vector.broadcast %c3_i32_48 : i32 to vector<8x8xi32>
    %105 = arith.cmpi eq, %38, %104 : vector<8x8xi32>
    %cst_49 = arith.constant 0.000000e+00 : f32
    %106 = vector.broadcast %cst_49 : f32 to vector<8x8xf32>
    %107 = arith.select %105, %77, %106 : vector<8x8xi1>, vector<8x8xf32>
    %cst_50 = arith.constant dense<0.000000e+00> : vector<8xf32>
    %108 = vector.multi_reduction <add>, %107, %cst_50 [1] : vector<8x8xf32> to vector<8xf32>
    %109 = vector.shape_cast %108 : vector<8xf32> to vector<8x1xf32>
    %c4_i32_51 = arith.constant 4 : i32
    %110 = vector.broadcast %c4_i32_51 : i32 to vector<8x8xi32>
    %111 = arith.cmpi eq, %38, %110 : vector<8x8xi32>
    %cst_52 = arith.constant 0.000000e+00 : f32
    %112 = vector.broadcast %cst_52 : f32 to vector<8x8xf32>
    %113 = arith.select %111, %77, %112 : vector<8x8xi1>, vector<8x8xf32>
    %cst_53 = arith.constant dense<0.000000e+00> : vector<8xf32>
    %114 = vector.multi_reduction <add>, %113, %cst_53 [1] : vector<8x8xf32> to vector<8xf32>
    %115 = vector.shape_cast %114 : vector<8xf32> to vector<8x1xf32>
    %116 = tpu.concatenate %91, %97, %103, %109, %115 in 1 : vector<8x1xf32>, vector<8x1xf32>, vector<8x1xf32>, vector<8x1xf32>, vector<8x1xf32> -> vector<8x5xf32>
    %c0_54 = arith.constant 0 : index
    %c0_55 = arith.constant 0 : index
    %117 = vector.load %arg15[%c0_54, %c0_55] : memref<5x8xf32, #tpu.memory_space<vmem>>, vector<5x8xf32>
    %cst_56 = arith.constant dense<0.000000e+00> : vector<8x8xf32>
    %118 = tpu.matmul %116, %117, %cst_56 {dimension_numbers = #tpu.dot_dimension_numbers<[1], [0], [0], [1], [0, 0, 1, 1], [], []>} : vector<8x5xf32>, vector<5x8xf32>, vector<8x8xf32> -> vector<8x8xf32>
    %119 = arith.addf %85, %118 : vector<8x8xf32>
    %120 = vector.broadcast %84 : vector<8x1xf32> to vector<8x8xf32>
    %121 = arith.mulf %119, %120 : vector<8x8xf32>
    %c0_i32_57 = arith.constant 0 : i32
    %122 = arith.cmpi eq, %arg2, %c0_i32_57 : i32
    %123 = arith.extui %122 : i1 to i32
    %c0_i32_58 = arith.constant 0 : i32
    %124 = arith.cmpi ne, %123, %c0_i32_58 : i32
    scf.if %124 {
      %c0_69 = arith.constant 0 : index
      %c0_70 = arith.constant 0 : index
      %134 = vector.load %arg13[%c0_69, %c0_70] : memref<1x32xf32, #tpu.memory_space<vmem>>, vector<1x32xf32>
      %135 = vector.shape_cast %134 : vector<1x32xf32> to vector<1x32xf32>
      %136 = vector.broadcast %135 : vector<1x32xf32> to vector<8x32xf32>
      %c0_71 = arith.constant 0 : index
      %c0_72 = arith.constant 0 : index
      %137 = vector.load %arg17[%c0_71, %c0_72] : memref<8x32xf32, #tpu.memory_space<vmem>>, vector<8x32xf32>
      tpu.vector_store %arg17[%c0_71, %c0_72], %136 {strides = array<i32>} : memref<8x32xf32, #tpu.memory_space<vmem>>, vector<8x32xf32>,
    } else {
    }
    %c0_59 = arith.constant 0 : index
    %c0_60 = arith.constant 0 : index
    %125 = vector.load %arg17[%c0_59, %c0_60] : memref<8x32xf32, #tpu.memory_space<vmem>>, vector<8x32xf32>
    %c0_61 = arith.constant 0 : index
    %c0_62 = arith.constant 0 : index
    %c0_63 = arith.constant 0 : index
    %126 = vector.load %arg12[%c0_61, %c0_62, %c0_63] : memref<1x8x32xf32, #tpu.memory_space<vmem>>, vector<1x8x32xf32>
    %127 = vector.shape_cast %126 : vector<1x8x32xf32> to vector<8x32xf32>
    %cst_64 = arith.constant dense<0.000000e+00> : vector<8x32xf32>
    %128 = tpu.matmul %121, %127, %cst_64 {dimension_numbers = #tpu.dot_dimension_numbers<[1], [0], [0], [1], [0, 0, 1, 1], [], []>} : vector<8x8xf32>, vector<8x32xf32>, vector<8x32xf32> -> vector<8x32xf32>
    %129 = arith.addf %125, %128 : vector<8x32xf32>
    %c0_65 = arith.constant 0 : index
    %c0_66 = arith.constant 0 : index
    %130 = vector.load %arg17[%c0_65, %c0_66] : memref<8x32xf32, #tpu.memory_space<vmem>>, vector<8x32xf32>
    tpu.vector_store %arg17[%c0_65, %c0_66], %129 {strides = array<i32>} : memref<8x32xf32, #tpu.memory_space<vmem>>, vector<8x32xf32>,
    %c3_i32_67 = arith.constant 3 : i32
    %131 = arith.cmpi eq, %arg2, %c3_i32_67 : i32
    %132 = arith.extui %131 : i1 to i32
    %c0_i32_68 = arith.constant 0 : i32
    %133 = arith.cmpi ne, %132, %c0_i32_68 : i32
    scf.if %133 {
      %c0_69 = arith.constant 0 : index
      %c0_70 = arith.constant 0 : index
      %134 = vector.load %arg17[%c0_69, %c0_70] : memref<8x32xf32, #tpu.memory_space<vmem>>, vector<8x32xf32>
      %c0_71 = arith.constant 0 : index
      %c0_72 = arith.constant 0 : index
      %c0_73 = arith.constant 0 : index
      %135 = vector.load %arg16[%c0_71, %c0_72, %c0_73] : memref<1x8x32xf32, #tpu.memory_space<vmem>>, vector<1x8x32xf32>
      %136 = vector.shape_cast %135 : vector<1x8x32xf32> to vector<8x32xf32>
      %137 = vector.shape_cast %134 : vector<8x32xf32> to vector<1x8x32xf32>
      tpu.vector_store %arg16[%c0_71, %c0_72, %c0_73], %137 {strides = array<i32>} : memref<1x8x32xf32, #tpu.memory_space<vmem>>, vector<1x8x32xf32>,
    } else {
    }
    return
  }
  func.func @transform_0(%arg0: i32, %arg1: i32, %arg2: i32) -> (i32, i32, i32) {
    %c0_i32 = arith.constant 0 : i32
    %c0_i32_0 = arith.constant 0 : i32
    return %arg0, %arg1, %c0_i32 : i32, i32, i32
  }
  func.func @transform_1(%arg0: i32, %arg1: i32, %arg2: i32) -> (i32, i32, i32) {
    %c0_i32 = arith.constant 0 : i32
    %c0_i32_0 = arith.constant 0 : i32
    %c0_i32_1 = arith.constant 0 : i32
    return %arg0, %c0_i32, %c0_i32_0 : i32, i32, i32
  }
  func.func @transform_2(%arg0: i32, %arg1: i32, %arg2: i32) -> (i32, i32, i32) {
    %c0_i32 = arith.constant 0 : i32
    %c0_i32_0 = arith.constant 0 : i32
    %c0_i32_1 = arith.constant 0 : i32
    return %arg0, %c0_i32, %c0_i32_0 : i32, i32, i32
  }
  func.func @transform_3(%arg0: i32, %arg1: i32, %arg2: i32) -> (i32, i32, i32) {
    %c0_i32 = arith.constant 0 : i32
    %c0_i32_0 = arith.constant 0 : i32
    %c0_i32_1 = arith.constant 0 : i32
    return %arg2, %c0_i32, %c0_i32_0 : i32, i32, i32
  }
  func.func @transform_4(%arg0: i32, %arg1: i32, %arg2: i32) -> (i32, i32, i32) {
    %c0_i32 = arith.constant 0 : i32
    %c0_i32_0 = arith.constant 0 : i32
    %c0_i32_1 = arith.constant 0 : i32
    return %arg2, %c0_i32, %c0_i32_0 : i32, i32, i32
  }
  func.func @transform_5(%arg0: i32, %arg1: i32, %arg2: i32) -> (i32, i32, i32) {
    %c0_i32 = arith.constant 0 : i32
    %c0_i32_0 = arith.constant 0 : i32
    %c0_i32_1 = arith.constant 0 : i32
    return %arg2, %c0_i32, %c0_i32_0 : i32, i32, i32
  }
  func.func @transform_6(%arg0: i32, %arg1: i32, %arg2: i32) -> (i32, i32, i32) {
    %c0_i32 = arith.constant 0 : i32
    %c0_i32_0 = arith.constant 0 : i32
    %c0_i32_1 = arith.constant 0 : i32
    return %arg2, %c0_i32, %c0_i32_0 : i32, i32, i32
  }
  func.func @transform_7(%arg0: i32, %arg1: i32, %arg2: i32) -> (i32, i32, i32) {
    %c0_i32 = arith.constant 0 : i32
    %c0_i32_0 = arith.constant 0 : i32
    %c0_i32_1 = arith.constant 0 : i32
    return %arg2, %c0_i32, %c0_i32_0 : i32, i32, i32
  }
  func.func @transform_8(%arg0: i32, %arg1: i32, %arg2: i32) -> (i32, i32, i32) {
    %c0_i32 = arith.constant 0 : i32
    %c0_i32_0 = arith.constant 0 : i32
    %c0_i32_1 = arith.constant 0 : i32
    return %arg2, %c0_i32, %c0_i32_0 : i32, i32, i32
  }
  func.func @transform_9(%arg0: i32, %arg1: i32, %arg2: i32) -> (i32, i32, i32) {
    %c0_i32 = arith.constant 0 : i32
    %c0_i32_0 = arith.constant 0 : i32
    %c0_i32_1 = arith.constant 0 : i32
    return %arg2, %c0_i32, %c0_i32_0 : i32, i32, i32
  }
  func.func @transform_10(%arg0: i32, %arg1: i32, %arg2: i32) -> (i32, i32) {
    %c0_i32 = arith.constant 0 : i32
    %c0_i32_0 = arith.constant 0 : i32
    %c0_i32_1 = arith.constant 0 : i32
    return %c0_i32, %c0_i32_0 : i32, i32
  }
  func.func @transform_11(%arg0: i32, %arg1: i32, %arg2: i32) -> (i32, i32) {
    %c0_i32 = arith.constant 0 : i32
    %c0_i32_0 = arith.constant 0 : i32
    %c0_i32_1 = arith.constant 0 : i32
    return %c0_i32, %c0_i32_0 : i32, i32
  }
  func.func @transform_12(%arg0: i32, %arg1: i32, %arg2: i32) -> (i32, i32) {
    %c0_i32 = arith.constant 0 : i32
    %c0_i32_0 = arith.constant 0 : i32
    %c0_i32_1 = arith.constant 0 : i32
    return %c0_i32, %c0_i32_0 : i32, i32
  }
  func.func @transform_13(%arg0: i32, %arg1: i32, %arg2: i32) -> (i32, i32, i32) {
    %c0_i32 = arith.constant 0 : i32
    %c0_i32_0 = arith.constant 0 : i32
    return %arg0, %arg1, %c0_i32 : i32, i32, i32
  }
}

</mosaic_0001>

<bundles_post_ra>
// kernel: tpu_custom_call.1
= control target key start
LH: loop header
LB: loop body
LE: loop exit
PB: predicated region body
PF: predicated region fallthrough
CT: control target
= control target key end

     0   :  { %s1653_s0 = inlined_call_operand.vmem [shape: f32[2,8,32], index: 0, kind: input, shape index: {}]   ;;  %s1654_s1 = inlined_call_operand.vmem [shape: f32[2,8,32], index: 1, kind: input, shape index: {}]   ;;  %s1655_s2 = inlined_call_operand.vmem [shape: f32[2,8,32], index: 2, kind: input, shape index: {}]   ;;  %s1656_s3 = inlined_call_operand.vmem [shape: f32[4,32,8], index: 3, kind: input, shape index: {}]   ;;  %s1657_s4 = inlined_call_operand.vmem [shape: f32[4,1,8], index: 4, kind: input, shape index: {}]   ;;  %s1658_s5 = inlined_call_operand.vmem [shape: f32[4,32,8], index: 5, kind: input, shape index: {}]   ;;  %s1659_s6 = inlined_call_operand.vmem [shape: f32[4,1,8], index: 6, kind: input, shape index: {}]   ;;  %s1660_s7 = inlined_call_operand.vmem [shape: f32[4,32,8], index: 7, kind: input, shape index: {}]   ;;  %s1661_s8 = inlined_call_operand.vmem [shape: f32[4,1,8], index: 8, kind: input, shape index: {}]   ;;  %s1662_s9 = inlined_call_operand.vmem [shape: f32[4,8,32], index: 9, kind: input, shape index: {}]   ;;  %s1663_s10 = inlined_call_operand.vmem [shape: f32[1,32], index: 10, kind: input, shape index: {}]   ;;  %s1664_s11 = inlined_call_operand.vmem [shape: f32[5,8], index: 11, kind: input, shape index: {}]   ;;  %s1665_s12 = inlined_call_operand.vmem [shape: f32[5,8], index: 12, kind: input, shape index: {}]   ;;  %s1666_s13 = inlined_call_operand.hbm [shape: f32[2,8,32], index: 13, kind: output, shape index: {}]  }
   0x1   :  { %1679 = sst [smem:[#allocation16_spill]] %s1656_s3 }
   0x2   :  { %1680 = sst [smem:[#allocation17_spill]] %s1666_s13 }
   0x3   :  { %18 = vsyncpa [#allocation4], 0 }
   0x4   :  { %20 = vsyncpa [#allocation4 + $0x1], 0  ;;  %s1440_s25 = smov 0   ;;  %s1442_s26 = smov 0  }
   0x5   :  { %s1444_s27 = smov 0   ;;  %s1446_s28 = smov 0  }
   0x6   :  { %s1448_s29 = smov 0   ;;  %s1450_s30 = smov 0  }
   0x7   :  { %s1452_s14 = smov 0   ;;  %s1454_s15 = smov 0  }
   0x8 LB: > { %1681 = sst [smem:[#allocation6_spill]] %s1335_s25  ;;  %s1143_s16 = sadd.s32 4294967295, %s1363_s15   ;;  %s1363_s15 = sphi %s1454_s15, %s26_s15   ;;  %s1359_s14 = sphi %s1452_s14, %s1705_s14   ;;  %s1355_s30 = sphi %s1450_s30, %s1704_s30   ;;  %s1351_s29 = sphi %s1448_s29, %s1703_s29   ;;  %s1347_s28 = sphi %s1446_s28, %s1702_s28   ;;  %s1343_s27 = sphi %s1444_s27, %s1701_s27   ;;  %s1339_s26 = sphi %s1442_s26, %s1707_s26   ;;  %s1335_s25 = sphi %s1440_s25, %s1706_s25  }
   0x9   : > { %1682 = sst [smem:[#allocation7_spill]] %s1343_s27  ;;  %s1144_s17 = sadd.s32 4294967294, %s1363_s15  }
   0xa   : > { %1683 = sst [smem:[#allocation8_spill]] %s1355_s30  ;;  %s38_s18 = sadd.s32 1, %s1355_s30 }
   0xb   : > { %1684 = sst [smem:[#allocation9_spill]] %s1359_s14  ;;  %p39_p0 = scmp.ge.s32.totalorder %s38_s18, 4 }
   0xc   : > { %1685 = sst [smem:[#allocation10_spill]] %s1363_s15  ;;  %s45_s19 = sadd.s32 1, %s1359_s14 }
   0xd   : > { %p389_p1 = scmp.ne.s32.totalorder %s1343_s27, %s1339_s26  ;;  %p390_p2 = scmp.eq.s32.totalorder %s1143_s16, 7 }
   0xe   : > { %s1709_s18 = smov (%p39_p0, %s38_s18), 0  ;;  %s1711_s19 = smov (!%p39_p0, %s45_s19), %s1359_s14 }
   0xf   : > { %1686 = sst [smem:[#allocation11_spill]] %s1709_s18  ;;  %p1489_p3 = por %p390_p2, %p389_p1 }
  0x10   : > { %p395_p4 = scmp.ne.s32.totalorder %s1339_s26, %s1335_s25  ;;  %p47_p5 = scmp.ge.s32.totalorder %s1711_s19, 2 }
  0x11   : > { %s1687_s20 = scalar_select %p1489_p3, 1, 0 }
  0x12   : > { %p396_p6 = scmp.eq.s32.totalorder %s1144_s17, 7  ;;  %p1147_p7 = scmp.ge.s32.totalorder %s1363_s15, 1 }
  0x13   : > { %1688 = sst [smem:[#allocation12_spill]] %s1687_s20  ;;  %p496_p8 = scmp.lt.s32.totalorder %s1363_s15, 9 }
  0x14   : > { %s1713_s19 = smov (%p47_p5, %s1711_s19), 0  ;;  %p1499_p9 = por %p396_p6, %p395_p4 }
  0x15   : > { %1689 = sst [smem:[#allocation13_spill]] %s1713_s19  ;;  %p497_p10 = pnand %p1147_p7, %p496_p8 }
  0x16   : > { %s1690_s21 = scalar_select %p1499_p9, 1, 0 }
  0x17   : > { %s374_s22 = ssub.s32 %s1359_s14, %s1713_s19  ;;  %s379_s23 = sadd.s32 1, %s1343_s27 }
  0x18   : > { %1691 = sst [smem:[#allocation14_spill]] %s1690_s21  ;;  %p377_p11 = scmp.eq.s32.totalorder %s374_s22, 0 }
  0x19   : > { %500 = sbr.rel (%p497_p10) target bundleno = 989 (0x3dd), region = 72  ;;  %s1672_s16 = sand.u32 (!%p497_p10), 1, %s1339_s26  }
  0x1a   : > { %s1507_s24 = scalar_select %p377_p11, %s1343_s27, %s379_s23  }
  0x1b   : > { %p593_p12 = scmp.lt.s32.totalorder (!%p497_p10), %s1347_s28, 3  ;;  %s1513_s17 = sshll.u32 (!%p497_p10), %s1672_s16, 3 }
  0x1c   : > { %1692 = sst [smem:[#allocation15_spill]] %s1507_s24  ;;  %p578_p13 = scmp.lt.s32.totalorder (!%p497_p10), %s1351_s29, 1 }
  0x1d   : > { %s1693_s3 = sld [smem:[#allocation16_spill]] (!%p497_p10)  ;;  %p1169_p0 = scmp.ne.s32.totalorder (!%p497_p10), %s1347_s28, 0 }
  0x1e   : > { %s1517_s18 = scalar_select %p593_p12, %s1347_s28, 3  ;;  %vm630_vm0 = vcmask 261120   ;;  %v718_v10 = vld [vmem:[%s1664_s11] sm:$0x1f]  ;;  %vm719_vm1 = vcmask 64512   ;;  %v1365_v11 = vmov 4   ;;  %v747_v28 = vlaneseq }
  0x1f   : > { %s579_s22 = scalar_select %p578_p13, %s1351_s29, 1  ;;  %1162 = vmatpush.xpose.msk.msra.mxu3 %vm719_vm1, %v718_v10  ;;  %1259 = vset.pattern.permute.xlu2 %v1365_v11  ;;  %v1366_v12 = vmov 2   ;;  %v1367_v13 = vmov 0   ;;  %v1368_v21 = vmov 3   ;;  %v1369_v22 = vmov 1  }
  0x20   : > { %s1521_s23 = sshll.u32 %s1517_s18, 5  ;;  %s1158_s19 = sshll.u32 %s1517_s18, 3  ;;  %1257 = vset.pattern.permute.xlu1 %v1366_v12  ;;  %1255 = vset.pattern.permute.xlu0 %v1367_v13  ;;  %v748_v29 = vshrl.u32 %v747_v28, 7  ;;  %v752_v30 = vand.u32 127, %v747_v28  ;;  %vm860_vm9 = vcmask 1044480   ;;  %vm847_vm10 = vcmask 7168  }
  0x21   : > { %s1531_s16 = scalar_lea.vmem %s1662_s9, %s1158_s19  ;;  %s605_s13 = scalar_lea.vmem %s1658_s5, %s1521_s23  ;;  %vm849_vm11 = vcmask 15360   ;;  %vm851_vm12 = vcmask 23552   ;;  %vm853_vm13 = vcmask 31744   ;;  %vm856_vm14 = vcmask 39936  }
  0x22   : > { %s1537_s20 = sshll.u32 %s579_s22, 3  ;;  %v658_v2 = vld [vmem:[%s605_s13 + $0x18] sm:$0xff]  ;;  %v657_v3 = vld [vmem:[%s605_s13 + $0x10] sm:$0xff]  ;;  %v656_v5 = vld [vmem:[%s605_s13 + $0x8] sm:$0xff]  ;;  %s608_s19 = scalar_lea.vmem %s1659_s6, %s1517_s18  ;;  %v753_v31 = vsub.s32 %v752_v30, %v748_v29 }
  0x23   : > { %s597_s24 = scalar_lea.vmem %s1693_s3, %s1521_s23  ;;  %678 = vmatpush.msra.mxu1 %v658_v2  ;;  %s584_s27 = scalar_lea.vmem %s1653_s0, %s1537_s20  ;;  %v655_v8 = vld [vmem:[%s605_s13] sm:$0xff] }
  0x24   : > { %v625_v0 = vld [vmem:[%s597_s24 + $0x18] sm:$0xff]  ;;  %v624_v1 = vld [vmem:[%s597_s24 + $0x10] sm:$0xff]  ;;  %v623_v4 = vld [vmem:[%s597_s24 + $0x8] sm:$0xff]  ;;  %s600_s3 = scalar_lea.vmem %s1657_s4, %s1517_s18  ;;  %s588_s22 = scalar_lea.vmem %s1654_s1, %s1537_s20  ;;  %v755_v32 = vsub.s32 0, %v753_v31  ;;  %vm754_vm2 = vcmp.lt.s32.totalorder %v753_v31, 0 }
  0x25   : > { %646 = vmatpush.msra.mxu0 %v625_v0  ;;  %v622_v6 = vld [vmem:[%s597_s24] sm:$0xff]  ;;  %679 = vmatpush.msra.mxu1 %v657_v3  ;;  %s613_s24 = scalar_lea.vmem %s1660_s7, %s1521_s23  ;;  %s616_s30 = scalar_lea.vmem %s1661_s8, %s1517_s18 }
  0x26   : > { %v621_v7 = vld [vmem:[%s584_s27] sm:$0xff]  ;;  %v690_v23 = vld [vmem:[%s613_s24 + $0x18] sm:$0xff]  ;;  %v689_v24 = vld [vmem:[%s613_s24 + $0x10] sm:$0xff]  ;;  %v756_v33 = vsel %vm754_vm2, %v755_v32, %v753_v31 }
  0x27   : > { %647 = vmatpush.msra.mxu0 %v624_v1  ;;  %680 = vmatpush.msra.mxu1 %v656_v5  ;;  %v654_v9 = vld [vmem:[%s588_s22] sm:$0xff]  ;;  %v688_v25 = vld [vmem:[%s613_s24 + $0x8] sm:$0xff]  ;;  %s592_s22 = scalar_lea.vmem %s1655_s2, %s1537_s20  ;;  %vm757_vm3 = vcmp.lt.s32.totalorder %v756_v33, 4 }
  0x28   : > { %v1261_v14 = vld [vmem:[%s600_s3] ss:$0 sm:$0xff]  ;;  %710 = vmatpush.msra.mxu2 %v690_v23  ;;  %v758_v36 = vsel %vm757_vm3, %v756_v33, 4 }
  0x29   : > { %648 = vmatpush.msra.mxu0 %v623_v4  ;;  %681 = vmatpush.msra.mxu1 %v655_v8  ;;  %v1262_v15 = vld [vmem:[%s608_s19] ss:$0 sm:$0xff]  ;;  %vm759_vm4 = vcmp.eq.s32.totalorder %v758_v36, 0  ;;  %vm766_vm5 = vcmp.eq.s32.totalorder %v758_v36, 1  ;;  %vm772_vm6 = vcmp.eq.s32.totalorder %v758_v36, 2  ;;  %vm778_vm7 = vcmp.eq.s32.totalorder %v758_v36, 3 }
  0x2a   : > { %1160 = vmatmul.msk.f32.vlgmr.msra.gmra.mxu1 %vm630_vm0, %v654_v9  ;;  %711 = vmatpush.msra.mxu2 %v689_v24  ;;  %v687_v26 = vld [vmem:[%s613_s24] sm:$0xff]  ;;  %vm784_vm8 = vcmp.eq.s32.totalorder %v758_v36, 4  ;;  %s577_s19 = scalar_lea.vmem [#allocation3], %s1513_s17 }
  0x2b   : > { %649 = vmatpush.msra.mxu0 %v622_v6  ;;  %v686_v27 = vld [vmem:[%s592_s22] sm:$0xff] }
  0x2c   : > { %1159 = vmatmul.msk.f32.vlgmr.msra.gmra.mxu0 %vm630_vm0, %v621_v7  ;;  %712 = vmatpush.msra.mxu2 %v688_v25  ;;  %v1263_v49 = vld [vmem:[%s616_s30] ss:$0 sm:$0xff] }
  0x2d   : > { %v855_v3 = vld [vmem:[%s1665_s12] sm:$0x1f] }
  0x2e   : > { %713 = vmatpush.msra.mxu2 %v687_v26  ;;  %1166 = vmatpush.msk.msrb.mxu0 %vm860_vm9, %v855_v3 }
  0x2f   : > { %1161 = vmatmul.msk.f32.vlgmr.msra.gmra.mxu2 %vm630_vm0, %v686_v27 }
  0xa7   : > { %v683_v18 = vpop.f32.mrf.mxu1 }
  0xa8   : > { %v684_v19 = vadd.f32 %v1262_v15, %v683_v18 }
  0xa9   : > { %v651_v16 = vpop.f32.mrf.mxu0 }
  0xaa   : > { %v652_v17 = vadd.f32 %v1261_v14, %v651_v16  ;;  %1164 = vmatpush.xpose.msk.msrb.mxu3 %vm719_vm1, %v684_v19 }
  0xac   : > { %1163 = vmatmul.msk.f32.vlgmr.msra.gmra.mxu3 %vm719_vm1, %v652_v17 }
  0xb2   : > { %v715_v50 = vpop.f32.mrf.mxu2 }
  0xb3   : > { %v716_v51 = vadd.f32 %v1263_v49, %v715_v50 }
  0xb4   : > { %1165 = vmatmul.msk.f32.vlgmr.msrb.gmra.mxu3 %vm719_vm1, %v652_v17 }
  0xb5   : > { %902 = vmatpush.msrb.mxu1 %v716_v51 }
 0x12f   : > { %v743_v20 = vpop.f32.mrf.mxu3 }
 0x130   : > { %786 = vperm.xlu2 %1259, %v743_v20   ;;  %774 = vperm.xlu1 %1257, %v743_v20  }
 0x131   : > { %762 = vperm.xlu0 %1255, %v743_v20  }
 0x137   : > { %v810_v44 = vpop.f32.mrf.mxu3 }
 0x138   : > { %1258 = vset.pattern.permute.xlu1 %v1368_v21 }
 0x139   : > { %1256 = vset.pattern.permute.xlu0 %v1369_v22  ;;  %780 = vperm.xlu1 %1258, %v743_v20  }
 0x13a   : > { %768 = vperm.xlu0 %1256, %v743_v20  }
 0x142   : > { %1260 = vset.pattern.permute.xlu0 %v1365_v11 }
 0x18a   : > { %v787_v42 = vpop.permute.xlu2 %786 }
 0x1a2   : > { %v775_v35 = vpop.permute.xlu1 %774 }
 0x1a3   : > { %v763_v34 = vpop.permute.xlu0 %762 }
 0x1a4   : > { %v765_v37 = vsel %vm759_vm4, %v763_v34, 0.0 }
 0x1ab   : > { %v781_v40 = vpop.permute.xlu1 %780 }
 0x1ac   : > { %v769_v38 = vpop.permute.xlu0 %768 }
 0x1ad   : > { %v771_v39 = vsel %vm766_vm5, %v769_v38, %v765_v37 }
 0x1ae   : > { %v777_v41 = vsel %vm772_vm6, %v775_v35, %v771_v39 }
 0x1af   : > { %v783_v43 = vsel %vm778_vm7, %v781_v40, %v777_v41 }
 0x1b0   : > { %v789_v45 = vsel %vm784_vm8, %v787_v42, %v783_v43 }
 0x1b1   : > { %v811_v46 = vadd.f32 %v810_v44, %v789_v45 }
 0x1b3   : > { %v813_v47 = vmul.f32 0.35355338, %v811_v46 }
 0x1b5   : > { %v814_v48 = vsel %vm719_vm1, %v813_v47, -inf }
 0x1b6   : > { %815 = vmax.xlane.f32.xlu2 %v814_v48 }
 0x229   : > { %v816_v52 = vpop.xlane.xlu2 %815 }
 0x22a   : > { %v817_v53 = vsub.f32 %v813_v47, %v816_v52 }
 0x22c   : > { %v818_v54 = vmul.f32 1.442695, %v817_v53 }
 0x22e   : > { %1264 = vpow2.f32 %v818_v54 }
 0x234   : > { %v1265_v55 = vpop.eup %1264 }
 0x235   : > { %1168 = vmatmul.msk.f32.vlgmr.msrb.gmra.mxu1 %vm719_vm1, %v1265_v55  ;;  %v835_v56 = vsel %vm772_vm6, %v1265_v55, 0.0  ;;  %v831_v57 = vsel %vm766_vm5, %v1265_v55, 0.0  ;;  %v827_v58 = vsel %vm759_vm4, %v1265_v55, 0.0  ;;  %v839_v62 = vsel %vm778_vm7, %v1265_v55, 0.0 }
 0x236   : > { %v836_v59 = vsel %vm719_vm1, %v835_v56, 0.0  ;;  %v832_v60 = vsel %vm719_vm1, %v831_v57, 0.0  ;;  %v828_v61 = vsel %vm719_vm1, %v827_v58, 0.0  ;;  %v843_v63 = vsel %vm784_vm8, %v1265_v55, 0.0 }
 0x237   : > { %837 = vadd.xlane.f32.xlu2 %v836_v59  ;;  %833 = vadd.xlane.f32.xlu0 %v832_v60  ;;  %v840_v0 = vsel %vm719_vm1, %v839_v62, 0.0  ;;  %v844_v1 = vsel %vm719_vm1, %v843_v63, 0.0  ;;  %v820_v2 = vsel %vm719_vm1, %v1265_v55, 0.0 }
 0x238   : > { %829 = vadd.xlane.f32.xlu1 %v828_v61 }
 0x23f   : > { %841 = vadd.xlane.f32.xlu2 %v840_v0 }
 0x240   : > { %845 = vadd.xlane.f32.xlu1 %v844_v1 }
 0x247   : > { %821 = vadd.xlane.f32.xlu2 %v820_v2 }
 0x2aa   : > { %v838_v4 = vpop.xlane.xlu2 %837  ;;  %v834_v6 = vpop.xlane.xlu0 %833 }
 0x2ab   : > { %v830_v5 = vpop.xlane.xlu1 %829 }
 0x2ac   : > { %v848_v7 = vsel %vm847_vm10, %v830_v5, %v834_v6 }
 0x2ad   : > { %v850_v9 = vsel %vm849_vm11, %v848_v7, %v838_v4 }
 0x2b2   : > { %v842_v8 = vpop.xlane.xlu2 %841  ;;  %v904_v17 = vpop.f32.mrf.mxu1 }
 0x2b3   : > { %v852_v10 = vsel %vm851_vm12, %v850_v9, %v842_v8  ;;  %v846_v11 = vpop.xlane.xlu1 %845 }
 0x2b4   : > { %v854_v12 = vsel %vm853_vm13, %v852_v10, %v846_v11 }
 0x2b5   : > { %1167 = vmatmul.msk.f32.vlgmr.msrb.gmra.mxu0 %vm856_vm14, %v854_v12 }
 0x2ba   : > { %v822_v13 = vpop.xlane.xlu2 %821 }
 0x2bb   : > { %1266 = vrcp.f32 %v822_v13 }
 0x2c1   : > { %v1267_v14 = vpop.eup %1266 }
 0x2c2   : > { %v824_v15 = vmul.f32 %v1267_v14, %v822_v13 }
 0x2c4   : > { %v825_v16 = vsub.f32 2.0, %v824_v15 }
 0x2c6   : > { %v826_v19 = vmul.f32 %v1267_v14, %v825_v16 }
 0x331   : > { %911 = sbr.rel (%p1169_p0) target bundleno = 824 (0x338), region = 76 }
 0x332   : > { %v881_v18 = vpop.f32.mrf.mxu0 }
 0x333   : > { %v905_v20 = vadd.f32 %v904_v17, %v881_v18 }
 0x335   : > { %v907_v21 = vmul.f32 %v905_v20, %v826_v19 }
 0x336   : > { %v1268_v22 = vld [vmem:[%s1663_s10] ss:$0 sm:$0xff] }
 0x337   : > { %916 = vst.msk [vmem:[#allocation2] sm:$0xff] %vm630_vm0, %v1268_v22 }
 0x338 PF: > { %v918_v23 = vld [vmem:[%s1531_s16] sm:$0xff]  ;;  %p1171_p1 = scmp.ne.s32.totalorder %s1347_s28, 3 }
 0x339   : > { %937 = vmatpush.msrb.mxu2 %v918_v23 }
 0x33a   : > { %1170 = vmatmul.msk.f32.vlgmr.msrb.gmra.mxu2 %vm719_vm1, %v907_v21 }
 0x33e   : > { %v917_v24 = vld [vmem:[#allocation2] sm:$0xff] }
 0x3bc   : > { %947 = sbr.rel (%p1171_p1) target bundleno = 969 (0x3c9), region = 80 }
 0x3bd   : > { %v939_v25 = vpop.f32.mrf.mxu2 }
 0x3be   : > { %v942_v26 = vadd.f32 %v939_v25, %v917_v24 }
 0x3c0   : > { %943 = vst.msk [vmem:[#allocation2] sm:$0xff] %vm630_vm0, %v942_v26 }
 0x3c7   : > { %v948_v27 = vld [vmem:[#allocation2] sm:$0xff] }
 0x3c8   : > { %949 = vst.msk [vmem:[%s577_s19] sm:$0xff] %vm630_vm0, %v948_v27 }
 0x3c9 PF: > { %s1173_s3 = sshll.u32 %s1351_s29, 3  ;;  %s1695_s24 = sld [smem:[#allocation17_spill]] }
 0x3ca   : > { %s964_s15 = sshll.u32 %s577_s19, 4  ;;  %s1696_s20 = sand.u32 1, %s1339_s26   ;;  %s965_s15 = int_to_ptr.vmem [resolvable:$true] %s964_s15 }
 0x3cb   : > { %s951_s23 = scalar_lea.sflag [#allocation4], %s1696_s20 }
 0x3cf   : > { %s962_s27 = scalar_lea.hbm %s1695_s24, %s1173_s3  ;;  %s1289_s29 = scalar_lea.hbm %s1695_s24, 16 }
 0x3d0   : > { %s966_s22 = sshll.u32 %s962_s27, 4  ;;  %s967_s22 = int_to_ptr.hbm [resolvable:$true] %s966_s22 }
 0x3d1   : > { %s1283_s28 = sshra.s32 %s967_s22, 4  ;;  %s1284_s28 = int_to_ptr.hbm [resolvable:$true] %s1283_s28 }
 0x3d2   : > { %s1285_s30 = scalar_lea.hbm %s1284_s28, 8  ;;  %p1290_p6 = scmp.lt.s32.totalorder %s1284_s28, %s1695_s24 }
 0x3d3   : > { %p1286_p2 = scmp.ne.s32.totalorder %s1284_s28, %s1285_s30  ;;  %p1291_p7 = scmp.lt.s32.totalorder %s1289_s29, %s1285_s30 }
 0x3d5   : > { %p1287_p4 = pnand %p1286_p2, %p1489_p3  ;;  %p1292_p8 = por %p1291_p7, %p1290_p6 }
 0x3d7   : > { %p1288_p5 = pneg %p1287_p4 }
 0x3d9   : > { %p1293_p10 = pnand %p1292_p8, %p1288_p5 }
 0x3db   : > { %1296 = shalt.err (!%p1293_p10)
}
 0x3dc   : > { %1179 = dma.vmem_to_hbm [thread:$0]  (%p1489_p3), %s965_s15, 128, %s967_s22, %s951_s23  }
 0x3dd PF: > { %s1697_s19 = sld [smem:[#allocation10_spill]] }
 0x3de   : > { %s1698_s3 = sld [smem:[#allocation6_spill]] }
 0x3e3   : > { %p1185_p11 = scmp.ge.s32.totalorder %s1697_s19, 2 }
 0x3e4   : > { %s978_s13 = sand.u32 1, %s1698_s3  }
 0x3e5   : > { %p1182_p12 = pnand %p1185_p11, %p1499_p9  ;;  %s979_s27 = scalar_lea.sflag [#allocation4], %s978_s13 }
 0x3e7   : > { %p1183_p13 = pneg %p1182_p12 }
 0x3e9   : > { %1330 = dma.done.wait (%p1183_p13), %s979_s27, 128  }
 0x3ea   : > { %1332 = vsyncadd (%p1183_p13), %s979_s27, 4294967168  ;;  %s26_s15 = sadd.s32 1, %s1697_s19   ;;  %s1700_s20 = sld [smem:[#allocation7_spill]] }
 0x3eb   : > { %p23_p0 = scmp.ge.s32.totalorder %s26_s15, 10   ;;  %s1701_s27 = sld [smem:[#allocation15_spill]] }
 0x3ec   : > { %s1702_s28 = sld [smem:[#allocation8_spill]]  ;;  %s1706_s25 = smov %s1339_s26 }
 0x3ed   : > { %s1703_s29 = sld [smem:[#allocation9_spill]]  ;;  %25 = sbr.rel (!%p23_p0) target bundleno = 8 (0x8), region = 142 }
 0x3ee   : > { %s1704_s30 = sld [smem:[#allocation11_spill]] }
 0x3ef   : > { %s1705_s14 = sld [smem:[#allocation13_spill]] }
 0x3f0   : > { %s1707_s26 = smov %s1700_s20 }
 0x3f2   :  { %985 = vsyncpa [#allocation4], 1 }
 0x3f3   :  { %987 = vsyncpa [#allocation4 + $0x1], 1 }

</bundles_post_ra>
